<compile_context>
chip_gen: v6e
topology: v6e:2x2x1
jax: 0.10.0
libtpu: 0.0.40
codegen_flags: <defaults>
</compile_context>

<pallas_src>
import math
import numpy as np
import jax
import jax.numpy as jnp
from jax.experimental import pallas as pl
from jax.experimental.pallas import tpu as pltpu


def _haar_dwt_matrices(height, width, dtype=np.float32):
    """Builds the DWT matrices exactly like DWT_2D.get_matrix() for 'haar'."""
    # pywt.Wavelet('haar'): rec_lo = [1/sqrt(2), 1/sqrt(2)], rec_hi = [1/sqrt(2), -1/sqrt(2)]
    inv_sqrt2 = 1.0 / math.sqrt(2.0)
    band_low = [inv_sqrt2, inv_sqrt2]
    band_high = [inv_sqrt2, -inv_sqrt2]
    band_length = len(band_low)

    L_h = height // 2
    L_w = width // 2
    matrix_h = np.zeros((L_h, height), dtype=dtype)      # matrix_low_0
    matrix_g = np.zeros((L_h, height), dtype=dtype)      # matrix_high_0
    matrix_h_1 = np.zeros((width, L_w), dtype=dtype)     # matrix_low_1
    matrix_g_1 = np.zeros((width, L_w), dtype=dtype)     # matrix_high_1

    for i in range(L_h):
        for j in range(band_length):
            idx = (2 * i + j) % height
            matrix_h[i, idx] = band_low[j]
            matrix_g[i, idx] = band_high[j]
    for i in range(L_w):
        for j in range(band_length):
            idx = (2 * i + j) % width
            matrix_h_1[idx, i] = band_low[j]
            matrix_g_1[idx, i] = band_high[j]
    return matrix_h, matrix_h_1, matrix_g, matrix_g_1


def _fused_column_operator(mh1, mg1):
    """Mbig (2W, W) such that [x_even_row | x_odd_row] @ Mbig = [LL | LH + HL].

    Derivation: L = (x_e + x_o)/sqrt(2), Hb = (x_e - x_o)/sqrt(2), then
    LL = L @ mh1 and LH + HL = L @ mg1 + Hb @ mh1.  Folding the row transform
    into the column matrices gives the block operator below.
    """
    inv_sqrt2 = 1.0 / math.sqrt(2.0)
    mh1 = np.asarray(mh1, np.float32)
    mg1 = np.asarray(mg1, np.float32)
    top = np.concatenate([mh1, mg1 + mh1], axis=1)   # even rows
    bot = np.concatenate([mh1, mg1 - mh1], axis=1)   # odd rows
    return (np.concatenate([top, bot], axis=0) * inv_sqrt2).astype(np.float32)


def wpl_outc_kernel(x_ref, mbig_ref, w_ref, b_ref, o_ref):
    # x_ref:    (1, C, Ht, 2W)  even/odd Haar row pairs packed along lanes
    # mbig_ref: (2W, W)         fused Haar operator (see _fused_column_operator)
    # w_ref:    (Co, C)         1x1 conv weight
    # b_ref:    (Co, 1, 1)      1x1 conv bias
    # o_ref:    (1, Co, Ht, Wh)
    _, C, Ht, W2 = x_ref.shape
    W = mbig_ref.shape[1]
    Wh = W // 2

    # Fold channels (and row-pairs) into M; reshape is layout-free when Ht % 8 == 0.
    x2d = x_ref[0].astype(jnp.float32).reshape(C * Ht, W2)

    # Single wide MXU matmul: whole 2-D Haar DWT + the LH+HL sum, fused.
    out2 = jnp.dot(x2d, mbig_ref[...], preferred_element_type=jnp.float32)  # (C*Ht, W)
    r = out2.reshape(C, Ht, W)
    ll = r[:, :, :Wh]          # LL band
    s = r[:, :, Wh:]           # LH + HL

    # Softmax2d over the channel axis (reduction over a leading dim: cheap VPU work).
    m = jnp.max(s, axis=0, keepdims=True)
    e = jnp.exp(s - m)
    p = e * (1.0 / jnp.sum(e, axis=0, keepdims=True))

    wpl = ll * (1.0 + p)       # LL + LL * softmax2d(LH + HL)

    # Fused 1x1 convolution: contract over channels, add bias.
    y = jnp.einsum('oc,chw->ohw', w_ref[...], wpl,
                   preferred_element_type=jnp.float32)
    y = y + b_ref[...]
    o_ref[0] = y.astype(o_ref.dtype)


def _pick_h_tile(c, hh, w, itemsize, target_bytes=4 << 20):
    """Largest H/2 tile (multiple of 8 when actually tiling) within a VMEM budget."""
    if c * hh * 2 * w * itemsize <= target_bytes or hh % 8 != 0:
        return hh
    best, cand = 8, 8
    while cand < hh:
        if hh % cand == 0 and c * cand * 2 * w * itemsize <= target_bytes:
            best = cand
        cand *= 2
    return best


def wpl_outchannels_forward(x, mh1, mg1, conv_w, conv_b):
    B, C, H, W = x.shape
    assert H % 2 == 0 and W % 2 == 0
    Hh, Wh = H // 2, W // 2
    Co = conv_w.shape[0]

    mbig = jnp.asarray(_fused_column_operator(mh1, mg1))          # (2W, W)

    # Free (contiguous) reshape: each even/odd row pair becomes one 2W-wide row.
    x4 = jnp.reshape(x, (B, C, Hh, 2 * W))

    Ht = _pick_h_tile(C, Hh, W, x.dtype.itemsize)
    n_t = Hh // Ht

    wc = conv_w.astype(jnp.float32)
    bias3 = conv_b.reshape(Co, 1, 1).astype(jnp.float32)

    return pl.pallas_call(
        wpl_outc_kernel,
        out_shape=jax.ShapeDtypeStruct((B, Co, Hh, Wh), x.dtype),
        grid_spec=pltpu.PrefetchScalarGridSpec(
            num_scalar_prefetch=0,
            grid=(B, n_t),
            in_specs=[
                pl.BlockSpec((1, C, Ht, 2 * W), lambda b, t: (b, 0, t, 0)),
                pl.BlockSpec((2 * W, W), lambda b, t: (0, 0)),
                pl.BlockSpec((Co, C), lambda b, t: (0, 0)),
                pl.BlockSpec((Co, 1, 1), lambda b, t: (0, 0, 0)),
            ],
            out_specs=pl.BlockSpec((1, Co, Ht, Wh), lambda b, t: (b, 0, t, 0)),
        ),
        compiler_params=pltpu.CompilerParams(
            dimension_semantics=("parallel", "parallel")),
    )(x4, mbig, wc, bias3)


def wpl_outchannels_reference(x, mh0, mh1, mg0, mg1, conv_w, conv_b):
    """Pure-JAX reference mirroring the PyTorch WPL_Outchannels forward."""
    B, C, H, W = x.shape
    hp = jax.lax.Precision.HIGHEST
    x2d = x.reshape(B * C, H, W).astype(jnp.float32)
    L = jnp.matmul(mh0, x2d, precision=hp)
    Hb = jnp.matmul(mg0, x2d, precision=hp)
    LL = jnp.matmul(L, mh1, precision=hp)
    LH = jnp.matmul(L, mg1, precision=hp)
    HL = jnp.matmul(Hb, mh1, precision=hp)
    Hh, Wh = H // 2, W // 2
    LL = LL.reshape(B, C, Hh, Wh)
    LH = LH.reshape(B, C, Hh, Wh)
    HL = HL.reshape(B, C, Hh, Wh)
    s = LH + HL
    p = jax.nn.softmax(s, axis=1)          # Softmax2d == softmax over channels
    wpl = LL + LL * p
    y = jnp.einsum('oc,bchw->bohw', conv_w, wpl, precision=hp)
    y = y + conv_b[None, :, None, None]
    return y.astype(x.dtype)


if __name__ == "__main__":
    B, C, H, W = 2, 4, 16, 16
    Co = 8
    key = jax.random.PRNGKey(0)
    kx, kw, kb = jax.random.split(key, 3)
    x = jax.random.normal(kx, (B, C, H, W), dtype=jnp.float32)
    # Deterministic 1x1 conv parameters (PyTorch-style init bound).
    bound = 1.0 / math.sqrt(C)
    conv_w = jax.random.uniform(kw, (Co, C), jnp.float32, -bound, bound)
    conv_b = jax.random.uniform(kb, (Co,), jnp.float32, -bound, bound)

    mh0, mh1, mg0, mg1 = _haar_dwt_matrices(H, W)

    out = wpl_outchannels_forward(x, mh1, mg1, conv_w, conv_b)
    out = jax.block_until_ready(out)

    ref = wpl_outchannels_reference(
        x, jnp.asarray(mh0), jnp.asarray(mh1), jnp.asarray(mg0), jnp.asarray(mg1),
        conv_w, conv_b)
    ref = jax.block_until_ready(ref)

    assert out.shape == (B, Co, H // 2, W // 2), out.shape
    np.testing.assert_allclose(np.asarray(out), np.asarray(ref), rtol=1e-5, atol=1e-5)

    print("KERNEL_OK")
</pallas_src>

<mosaic_0001>
module attributes {stable_mosaic.version = 11 : i64} {
  func.func @wpl_outc_kernel(%arg0: i32, %arg1: i32, %arg2: memref<1x4x8x32xf32, #tpu.memory_space<vmem>>, %arg3: memref<32x16xf32, #tpu.memory_space<vmem>>, %arg4: memref<8x4xf32, #tpu.memory_space<vmem>>, %arg5: memref<8x1x1xf32, #tpu.memory_space<vmem>>, %arg6: memref<1x8x8x8xf32, #tpu.memory_space<vmem>>) attributes {dimension_semantics = [#tpu.dimension_semantics<parallel>, #tpu.dimension_semantics<parallel>], iteration_bounds = array<i64: 2, 1>, scalar_prefetch = 0 : i64, scratch_operands = 0 : i64, tpu.core_type = #tpu.core_type<tc>, window_params = [{transform_indices = @transform_0, window_bounds = array<i64: 1, 4, 8, 32>}, {pipeline_mode = #tpu.pipeline_mode<synchronous>, transform_indices = @transform_1, window_bounds = array<i64: 32, 16>}, {pipeline_mode = #tpu.pipeline_mode<synchronous>, transform_indices = @transform_2, window_bounds = array<i64: 8, 4>}, {pipeline_mode = #tpu.pipeline_mode<synchronous>, transform_indices = @transform_3, window_bounds = array<i64: 8, 1, 1>}, {transform_indices = @transform_4, window_bounds = array<i64: 1, 8, 8, 8>}]} {
    %c0 = arith.constant 0 : index
    %c0_0 = arith.constant 0 : index
    %c0_1 = arith.constant 0 : index
    %c0_2 = arith.constant 0 : index
    %0 = vector.load %arg2[%c0, %c0_0, %c0_1, %c0_2] : memref<1x4x8x32xf32, #tpu.memory_space<vmem>>, vector<1x4x8x32xf32>
    %1 = vector.shape_cast %0 : vector<1x4x8x32xf32> to vector<4x8x32xf32>
    %2 = vector.shape_cast %1 : vector<4x8x32xf32> to vector<32x32xf32>
    %c0_3 = arith.constant 0 : index
    %c0_4 = arith.constant 0 : index
    %3 = vector.load %arg3[%c0_3, %c0_4] : memref<32x16xf32, #tpu.memory_space<vmem>>, vector<32x16xf32>
    %cst = arith.constant dense<0.000000e+00> : vector<32x16xf32>
    %4 = tpu.matmul %2, %3, %cst {dimension_numbers = #tpu.dot_dimension_numbers<[1], [0], [0], [1], [0, 0, 1, 1], [], []>} : vector<32x32xf32>, vector<32x16xf32>, vector<32x16xf32> -> vector<32x16xf32>
    %5 = vector.shape_cast %4 : vector<32x16xf32> to vector<4x8x16xf32>
    %6 = vector.extract_strided_slice %5 {offsets = [0, 0, 0], sizes = [4, 8, 8], strides = [1, 1, 1]} : vector<4x8x16xf32> to vector<4x8x8xf32>
    %7 = vector.extract_strided_slice %5 {offsets = [0, 0, 8], sizes = [4, 8, 8], strides = [1, 1, 1]} : vector<4x8x16xf32> to vector<4x8x8xf32>
    %cst_5 = arith.constant dense<0xFF800000> : vector<8x8xf32>
    %8 = vector.multi_reduction <maximumf>, %7, %cst_5 [0] : vector<4x8x8xf32> to vector<8x8xf32>
    %9 = vector.shape_cast %8 : vector<8x8xf32> to vector<1x8x8xf32>
    %10 = vector.broadcast %9 : vector<1x8x8xf32> to vector<4x8x8xf32>
    %11 = arith.subf %7, %10 : vector<4x8x8xf32>
    %12 = math.exp %11 : vector<4x8x8xf32>
    %cst_6 = arith.constant dense<0.000000e+00> : vector<8x8xf32>
    %13 = vector.multi_reduction <add>, %12, %cst_6 [0] : vector<4x8x8xf32> to vector<8x8xf32>
    %14 = vector.shape_cast %13 : vector<8x8xf32> to vector<1x8x8xf32>
    %cst_7 = arith.constant 1.000000e+00 : f32
    %15 = vector.broadcast %cst_7 : f32 to vector<1x8x8xf32>
    %16 = arith.divf %15, %14 : vector<1x8x8xf32>
    %17 = vector.broadcast %16 : vector<1x8x8xf32> to vector<4x8x8xf32>
    %18 = arith.mulf %12, %17 : vector<4x8x8xf32>
    %cst_8 = arith.constant 1.000000e+00 : f32
    %19 = vector.broadcast %cst_8 : f32 to vector<4x8x8xf32>
    %20 = arith.addf %19, %18 : vector<4x8x8xf32>
    %21 = arith.mulf %6, %20 : vector<4x8x8xf32>
    %c0_9 = arith.constant 0 : index
    %c0_10 = arith.constant 0 : index
    %22 = vector.load %arg4[%c0_9, %c0_10] : memref<8x4xf32, #tpu.memory_space<vmem>>, vector<8x4xf32>
    "tpu.trace_start"() <{level = 10 : i32, message = "oc,chw->ohw"}> : () -> ()
    %cst_11 = arith.constant dense<0.000000e+00> : vector<8x8x8xf32>
    %23 = tpu.matmul %22, %21, %cst_11 {dimension_numbers = #tpu.dot_dimension_numbers<[1], [0], [0], [1, 2], [0, 0, 1, 1, 1, 2], [], []>} : vector<8x4xf32>, vector<4x8x8xf32>, vector<8x8x8xf32> -> vector<8x8x8xf32>
    "tpu.trace_stop"() : () -> ()
    %c0_12 = arith.constant 0 : index
    %c0_13 = arith.constant 0 : index
    %c0_14 = arith.constant 0 : index
    %24 = vector.load %arg5[%c0_12, %c0_13, %c0_14] : memref<8x1x1xf32, #tpu.memory_space<vmem>>, vector<8x1x1xf32>
    %25 = vector.broadcast %24 : vector<8x1x1xf32> to vector<8x8x8xf32>
    %26 = arith.addf %23, %25 : vector<8x8x8xf32>
    %c0_15 = arith.constant 0 : index
    %c0_16 = arith.constant 0 : index
    %c0_17 = arith.constant 0 : index
    %c0_18 = arith.constant 0 : index
    %27 = vector.load %arg6[%c0_15, %c0_16, %c0_17, %c0_18] : memref<1x8x8x8xf32, #tpu.memory_space<vmem>>, vector<1x8x8x8xf32>
    %28 = vector.shape_cast %27 : vector<1x8x8x8xf32> to vector<8x8x8xf32>
    %29 = vector.shape_cast %26 : vector<8x8x8xf32> to vector<1x8x8x8xf32>
    tpu.vector_store %arg6[%c0_15, %c0_16, %c0_17, %c0_18], %29 {strides = array<i32>} : memref<1x8x8x8xf32, #tpu.memory_space<vmem>>, vector<1x8x8x8xf32>,
    return
  }
  func.func @transform_0(%arg0: i32, %arg1: i32) -> (i32, i32, i32, i32) {
    %c0_i32 = arith.constant 0 : i32
    %c0_i32_0 = arith.constant 0 : i32
    %c0_i32_1 = arith.constant 0 : i32
    return %arg0, %c0_i32, %arg1, %c0_i32_0 : i32, i32, i32, i32
  }
  func.func @transform_1(%arg0: i32, %arg1: i32) -> (i32, i32) {
    %c0_i32 = arith.constant 0 : i32
    %c0_i32_0 = arith.constant 0 : i32
    %c0_i32_1 = arith.constant 0 : i32
    return %c0_i32, %c0_i32_0 : i32, i32
  }
  func.func @transform_2(%arg0: i32, %arg1: i32) -> (i32, i32) {
    %c0_i32 = arith.constant 0 : i32
    %c0_i32_0 = arith.constant 0 : i32
    %c0_i32_1 = arith.constant 0 : i32
    return %c0_i32, %c0_i32_0 : i32, i32
  }
  func.func @transform_3(%arg0: i32, %arg1: i32) -> (i32, i32, i32) {
    %c0_i32 = arith.constant 0 : i32
    %c0_i32_0 = arith.constant 0 : i32
    %c0_i32_1 = arith.constant 0 : i32
    %c0_i32_2 = arith.constant 0 : i32
    return %c0_i32, %c0_i32_0, %c0_i32_1 : i32, i32, i32
  }
  func.func @transform_4(%arg0: i32, %arg1: i32) -> (i32, i32, i32, i32) {
    %c0_i32 = arith.constant 0 : i32
    %c0_i32_0 = arith.constant 0 : i32
    %c0_i32_1 = arith.constant 0 : i32
    return %arg0, %c0_i32, %arg1, %c0_i32_0 : i32, i32, i32, i32
  }
}

</mosaic_0001>

<bundles_post_ra>
// kernel: tpu_custom_call.1
= control target key start
LH: loop header
LB: loop body
LE: loop exit
PB: predicated region body
PF: predicated region fallthrough
CT: control target
= control target key end

     0   :  { %9 = vsyncpa [#allocation3], 0  ;;  %s1616_s0 = inlined_call_operand.vmem [shape: f32[2,4,8,32], index: 0, kind: input, shape index: {}]   ;;  %s1617_s1 = inlined_call_operand.vmem [shape: f32[32,16], index: 1, kind: input, shape index: {}]   ;;  %s1618_s2 = inlined_call_operand.vmem [shape: f32[8,4], index: 2, kind: input, shape index: {}]   ;;  %s1619_s3 = inlined_call_operand.vmem [shape: f32[8,1,1], index: 3, kind: input, shape index: {}]   ;;  %s1620_s4 = inlined_call_operand.hbm [shape: f32[2,8,8,8], index: 4, kind: output, shape index: {}]  }
   0x1   :  { %11 = vsyncpa [#allocation3 + $0x1], 0  ;;  %s1351_s15 = smov 0   ;;  %s1353_s16 = smov 0  }
   0x2   :  { %s1355_s17 = smov 0   ;;  %s1357_s18 = smov 0  }
   0x3   :  { %s1359_s19 = smov 0   ;;  %s1361_s20 = smov 0  }
   0x4 LB: > { %s1082_s21 = sadd.s32 4294967295, %s1303_s20   ;;  %s1083_s22 = sadd.s32 4294967294, %s1303_s20   ;;  %s1303_s20 = sphi %s1361_s20, %s17_s20   ;;  %s1299_s19 = sphi %s1359_s19, %s1631_s19   ;;  %s1295_s18 = sphi %s1357_s18, %s1630_s18   ;;  %s1291_s17 = sphi %s1355_s17, %s1629_s17   ;;  %s1287_s16 = sphi %s1353_s16, %s1628_s16   ;;  %s1283_s15 = sphi %s1351_s15, %s1627_s15  }
   0x5   : > { %s29_s23 = sadd.s32 1, %s1299_s19  ;;  %s129_s24 = sadd.s32 1, %s1291_s17 }
   0x6   : > { %p31_p0 = scmp.ge.s32.totalorder %s29_s23, 2  ;;  %p139_p1 = scmp.ne.s32.totalorder %s1291_s17, %s1287_s16 }
   0x7   : > { %p140_p2 = scmp.eq.s32.totalorder %s1082_s21, 1  ;;  %p145_p3 = scmp.ne.s32.totalorder %s1287_s16, %s1283_s15 }
   0x8   : > { %s1633_s23 = smov (%p31_p0, %s29_s23), 0  ;;  %p146_p5 = scmp.eq.s32.totalorder %s1083_s22, 1 }
   0x9   : > { %p1391_p4 = por %p140_p2, %p139_p1  ;;  %s124_s26 = ssub.s32 %s1299_s19, %s1633_s23 }
   0xa   : > { %p1086_p6 = scmp.ge.s32.totalorder %s1303_s20, 1  ;;  %p127_p7 = scmp.eq.s32.totalorder %s124_s26, 0 }
   0xb   : > { %p1398_p8 = por %p146_p5, %p145_p3  ;;  %p184_p9 = scmp.lt.s32.totalorder %s1303_s20, 3 }
   0xc   : > { %s1404_s28 = scalar_select %p127_p7, %s1291_s17, %s129_s24  }
   0xd   : > { %p185_p10 = pnand %p1086_p6, %p184_p9 }
   0xe   : > { %p213_p11 = scmp.lt.s32.totalorder (!%p185_p10), %s1295_s18, 1  ;;  %s1621_s22 = smov (!%p185_p10), 120  }
   0xf   : > { %188 = sbr.rel (%p185_p10) target bundleno = 886 (0x376), region = 36  ;;  %s1310_s24 = smov (!%p185_p10), 16  }
  0x10   : > { %s1311_s26 = smov (!%p185_p10), 8   ;;  %s1313_s29 = smov (!%p185_p10), 32  }
  0x11   : > { %s1314_s30 = smov (!%p185_p10), 24   ;;  %s1315_s5 = smov (!%p185_p10), 48  }
  0x12   : > { %s1316_s8 = smov (!%p185_p10), 40   ;;  %s1622_s11 = smov (!%p185_p10), 56  }
  0x13   : > { %s1625_s14 = smov (!%p185_p10), 56   ;;  %s1323_s6 = smov (!%p185_p10), 72  }
  0x14   : > { %v228_v0 = vld [vmem:[%s1617_s1 + $0x18] sm:$0xff]  ;;  %v227_v1 = vld [vmem:[%s1617_s1 + $0x10] sm:$0xff]  ;;  %v226_v2 = vld [vmem:[%s1617_s1 + $0x8] sm:$0xff]  ;;  %s214_s9 = scalar_select %p213_p11, %s1295_s18, 1  ;;  %vm229_vm0 = vcmask 261120   ;;  %vm327_vm1 = vcmask 130112   ;;  %v470_v51 = vlaneseq }
  0x15   : > { %1121 = vmatprep.subr.mxu0 %v228_v0  ;;  %v225_v3 = vld [vmem:[%s1617_s1] sm:$0xff]  ;;  %v1306_v47 = vmov 0.0   ;;  %v1307_v48 = vmov 0   ;;  %v1308_v49 = vmov 1983009808   ;;  %vm1312_vm2 = vmmov 0  }
  0x16   : > { %1122 = vmatpush3.msra.mxu0 %v228_v0  ;;  %s1109_s12 = sshll.u32 %s214_s9, 5  ;;  %1135 = vmatprep.subr.mxu1 %v1306_v47  ;;  %v468_v50 = vunpack.c.l.s4 %v1308_v49  ;;  %v471_v54 = vshrl.u32 %v470_v51, 7  ;;  %v1309_v58 = vmov 1934713408   ;;  %vm561_vm3 = vcmask 64512   ;;  %s210_s7 = sand.u32 1, %s1287_s16  }
  0x17   : > { %1123 = vmatprep.subr.mxu0 %v227_v1  ;;  %s220_s21 = scalar_lea.vmem %s1616_s0, %s1109_s12  ;;  %1215 = vset.pattern.permute.xlu1 %v1307_v48  ;;  %v500_v59 = vunpack.c.l.s4 %v1309_v58  ;;  %vm563_vm4 = vcmask 130048   ;;  %vm565_vm5 = vcmask 195584   ;;  %vm568_vm6 = vcmask 326656   ;;  %s1087_s9 = sshll.u32 %s210_s7, 6 }
  0x18   : > { %1124 = vmatpush3.msra.mxu0 %v227_v1  ;;  %v221_v4 = vld [vmem:[%s220_s21] sm:$0xff]  ;;  %v222_v5 = vld [vmem:[%s220_s21 + $0x8] sm:$0xff]  ;;  %v223_v6 = vld [vmem:[%s220_s21 + $0x10] sm:$0xff]  ;;  %1216 = vset.pattern.permute.xlu0 %v1307_v48  ;;  %v469_v53 = vunpack.c.0.s8 %v468_v50  ;;  %vm570_vm7 = vcmask 392192   ;;  %vm572_vm8 = vcmask 457728   ;;  %vm749_vm9 = vcmask 1043456  }
  0x19   : > { %1125 = vmatprep.subr.mxu0 %v226_v2  ;;  %1129 = vmatprep.mubr.msk.f32.mxu0 %vm229_vm0, %v221_v4  ;;  %v224_v7 = vld [vmem:[%s220_s21 + $0x18] sm:$0xff]  ;;  %vm745_vm10 = vcmask 31744   ;;  %s1322_s21 = smov 88   ;;  %s1110_s10 = sshll.u32 %s1295_s18, 10 }
  0x1a   : > { %1126 = vmatpush3.msra.mxu0 %v226_v2  ;;  %v1447_v60 = vsub.s32 %v469_v53, %v471_v54  ;;  %v501_v2 = vunpack.c.0.s8 %v500_v59  ;;  %1137 = vmatprep.mubr.msk.f32.mxu1 %vm1312_vm2, %v1306_v47  ;;  %s212_s12 = scalar_lea.vmem [#allocation2], %s1087_s9 }
  0x1b   : > { %1127 = vmatprep.subr.mxu0 %v225_v3  ;;  %s1004_s13 = sshll.u32 %s212_s12, 4  ;;  %s1558_s13 = int_to_ptr.vmem [resolvable:$true] %s1004_s13 }
  0x1c   : > { %1128 = vmatpush3.msra.mxu0 %v225_v3 }
  0x1d   : > { %1130 = vmatmul.mubr.msk.f32.vlgmr.msra.gmra.mxu0 %vm229_vm0, %v222_v5 }
  0x1e   : > { %1132 = vmatprep.mubr.msk.f32.mxu0 %vm229_vm0, %v223_v6 }
  0x21   : > { %1133 = vmatmul.mubr.msk.f32.gmra.mxu0 %vm229_vm0, %v224_v7 }
  0xdd   : > { %v1427_v8 = vpop.f32.mrf.mxu0 }
  0xde   : > { %v329_v13 = vsel %vm327_vm1, %v1427_v8, -inf }
  0xdf   : > { %v308_v9 = vpop.f32.mrf.mxu0 }
  0xe0   : > { %v328_v11 = vsel %vm327_vm1, %v308_v9, -inf }
  0xe1   : > { %v1429_v10 = vpop.f32.mrf.mxu0  ;;  %v332_v16 = vmax.f32 %v328_v11, %v329_v13  ;;  %v1454_v11 = vsub.s32 %v501_v2, %v471_v54 }
  0xe2   : > { %v331_v14 = vsel %vm327_vm1, %v1429_v10, -inf }
  0xe3   : > { %v318_v12 = vpop.f32.mrf.mxu0 }
  0xe4   : > { %v330_v15 = vsel %vm327_vm1, %v318_v12, -inf }
  0xe5   : > { %v333_v17 = vmax.f32 %v330_v15, %v331_v14 }
  0xe7   : > { %v334_v18 = vmax.f32 %v332_v16, %v333_v17 }
  0xe9   : > { %v335_v19 = vsub.f32 %v308_v9, %v334_v18  ;;  %v336_v20 = vsub.f32 %v1427_v8, %v334_v18  ;;  %v337_v21 = vsub.f32 %v318_v12, %v334_v18  ;;  %v338_v22 = vsub.f32 %v1429_v10, %v334_v18 }
  0xeb   : > { %v339_v23 = vmul.f32 1.442695, %v335_v19  ;;  %v341_v24 = vmul.f32 1.442695, %v336_v20  ;;  %v343_v25 = vmul.f32 1.442695, %v337_v21 }
  0xec   : > { %v345_v26 = vmul.f32 1.442695, %v338_v22  ;;  %v1094_v22 = vld [vmem:[%s1619_s3] ss:$0 sm:$0xff] }
  0xed   : > { %1217 = vpow2.f32 %v339_v23 }
  0xee   : > { %1219 = vpow2.f32 %v341_v24  ;;  %v1096_v24 = vld [vmem:[%s1619_s3 + $0x2] ss:$0 sm:$0xff] }
  0xef   : > { %1221 = vpow2.f32 %v343_v25  ;;  %v1095_v25 = vld [vmem:[%s1619_s3 + $0x1] ss:$0 sm:$0xff] }
  0xf0   : > { %1223 = vpow2.f32 %v345_v26  ;;  %v1097_v26 = vld [vmem:[%s1619_s3 + $0x3] ss:$0 sm:$0xff] }
  0xfa   : > { %v1218_v27 = vpop.eup %1217 }
  0xfb   : > { %v1220_v28 = vpop.eup %1219  ;;  %v347_v29 = vsel %vm327_vm1, %v1218_v27, 0.0 }
  0xfc   : > { %v1222_v30 = vpop.eup %1221  ;;  %v348_v31 = vsel %vm327_vm1, %v1220_v28, 0.0 }
  0xfd   : > { %v1224_v32 = vpop.eup %1223  ;;  %v349_v33 = vadd.f32 %v348_v31, %v347_v29  ;;  %v350_v34 = vsel %vm327_vm1, %v1222_v30, 0.0  ;;  %v1100_v29 = vld [vmem:[%s1619_s3 + $0x6] ss:$0 sm:$0xff] }
  0xfe   : > { %v352_v36 = vsel %vm327_vm1, %v1224_v32, 0.0 }
  0xff   : > { %v351_v35 = vadd.f32 %v350_v34, %v349_v33 }
 0x101   : > { %v353_v37 = vadd.f32 %v352_v36, %v351_v35 }
 0x103   : > { %1225 = vrcp.f32 %v353_v37 }
 0x110   : > { %v1226_v38 = vpop.eup %1225 }
 0x111   : > { %v358_v39 = vmul.f32 %v1226_v38, %v1222_v30  ;;  %v356_v40 = vmul.f32 %v1226_v38, %v1218_v27  ;;  %v359_v43 = vmul.f32 %v1226_v38, %v1224_v32  ;;  %v357_v44 = vmul.f32 %v1226_v38, %v1220_v28  ;;  %v1098_v27 = vld [vmem:[%s1619_s3 + $0x4] ss:$0 sm:$0xff]  ;;  %v1099_v28 = vld [vmem:[%s1619_s3 + $0x5] ss:$0 sm:$0xff]  ;;  %v1101_v30 = vld [vmem:[%s1619_s3 + $0x7] ss:$0 sm:$0xff] }
 0x113   : > { %v362_v41 = vadd.f32 1.0, %v358_v39  ;;  %v360_v42 = vadd.f32 1.0, %v356_v40  ;;  %v363_v45 = vadd.f32 1.0, %v359_v43  ;;  %v361_v46 = vadd.f32 1.0, %v357_v44  ;;  %v384_v44 = vld [vmem:[%s1618_s2] sm:$0xff] }
 0x115   : > { %372 = vrot.lane.b32.xlu1 %v362_v41, %s1621_s22  ;;  %368 = vrot.lane.b32.xlu0 %v360_v42, %s1621_s22 }
 0x119   : > { %374 = vrot.lane.b32.xlu1 %v363_v45, %s1621_s22  ;;  %370 = vrot.lane.b32.xlu0 %v361_v46, %s1621_s22 }
 0x187   : > { %v373_v52 = vpop.permute.xlu1 %372  ;;  %v369_v55 = vpop.permute.xlu0 %368 }
 0x188   : > { %v382_v56 = vmul.f32 %v373_v52, %v318_v12  ;;  %v380_v57 = vmul.f32 %v369_v55, %v308_v9 }
 0x18a   : > { %v465_v63 = vcombine.low %v380_v57, %v382_v56  ;;  %v466_v3 = vcombine.high %v380_v57, %v382_v56 }
 0x18b   : > { %v375_v61 = vpop.permute.xlu1 %374  ;;  %v371_v62 = vpop.permute.xlu0 %370 }
 0x18c   : > { %v383_v0 = vmul.f32 %v1429_v10, %v375_v61  ;;  %v381_v1 = vmul.f32 %v1427_v8, %v371_v62  ;;  %v473_v6 = vrot.slane %v465_v63, %v1447_v60  ;;  %v480_v12 = vrot.slane %v466_v3, %v1447_v60 }
 0x18e   : > { %v481_v4 = vcombine.low %v381_v1, %v383_v0  ;;  %v482_v5 = vcombine.high %v381_v1, %v383_v0 }
 0x190   : > { %v489_v7 = vrot.slane %v481_v4, %v1447_v60  ;;  %v496_v9 = vrot.slane %v482_v5, %v1447_v60 }
 0x192   : > { %v497_v13 = vcombine.low %v473_v6, %v489_v7  ;;  %v498_v14 = vcombine.high %v473_v6, %v489_v7  ;;  %v513_v15 = vcombine.low %v480_v12, %v496_v9  ;;  %v514_v18 = vcombine.high %v480_v12, %v496_v9 }
 0x194   : > { %v512_v10 = vrot.slane %v498_v14, %v1454_v11  ;;  %v505_v8 = vrot.slane %v497_v13, %v1454_v11  ;;  %v521_v17 = vrot.slane %v513_v15, %v1454_v11  ;;  %v528_v20 = vrot.slane %v514_v18, %v1454_v11 }
 0x196   : > { %538 = vrot.lane.b32.xlu1 %v512_v10, %s1310_s24  ;;  %v529_v16 = vcombine.high %v505_v8, %v1306_v47  ;;  %v530_v19 = vcombine.high %v512_v10, %v1306_v47  ;;  %v531_v21 = vcombine.high %v521_v17, %v1306_v47  ;;  %v532_v23 = vcombine.high %v528_v20, %v1306_v47 }
 0x198   : > { %534 = vrot.lane.b32.xlu0 %v529_v16, %s1311_s26 }
 0x19a   : > { %546 = vrot.lane.b32.xlu1 %v521_v17, %s1313_s29 }
 0x19c   : > { %542 = vrot.lane.b32.xlu0 %v530_v19, %s1314_s30 }
 0x19e   : > { %554 = vrot.lane.b32.xlu1 %v528_v20, %s1315_s5 }
 0x1a0   : > { %550 = vrot.lane.b32.xlu0 %v531_v21, %s1316_s8 }
 0x1a2   : > { %434 = vperm.xlu1 %1215, %v1094_v22  }
 0x1a4   : > { %558 = vrot.lane.b32.xlu0 %v532_v23, %s1622_s11  ;;  %s1556_s11 = scalar_lea.hbm %s1620_s4, %s1110_s10 }
 0x1a6   : > { %442 = vperm.xlu1 %1215, %v1096_v24  }
 0x1a8   : > { %438 = vperm.xlu0 %1216, %v1095_v25  }
 0x1aa   : > { %446 = vperm.xlu1 %1215, %v1097_v26  }
 0x1ac   : > { %450 = vperm.xlu0 %1216, %v1098_v27  }
 0x1ae   : > { %454 = vperm.xlu1 %1215, %v1099_v28  }
 0x1b0   : > { %458 = vperm.xlu0 %1216, %v1100_v29  }
 0x1b2   : > { %462 = vperm.xlu1 %1215, %v1101_v30  }
 0x208   : > { %v539_v31 = vpop.permute.xlu1 %538 }
 0x20a   : > { %v535_v32 = vpop.permute.xlu0 %534 }
 0x20b   : > { %v562_v33 = vsel %vm561_vm3, %v505_v8, %v535_v32 }
 0x20c   : > { %v564_v34 = vsel %vm563_vm4, %v562_v33, %v539_v31  ;;  %v547_v36 = vpop.permute.xlu1 %546 }
 0x20e   : > { %v543_v35 = vpop.permute.xlu0 %542 }
 0x20f   : > { %v566_v37 = vsel %vm565_vm5, %v564_v34, %v543_v35 }
 0x210   : > { %v567_v38 = vsel %vm229_vm0, %v566_v37, %v547_v36  ;;  %v555_v41 = vpop.permute.xlu1 %554 }
 0x212   : > { %v551_v39 = vpop.permute.xlu0 %550 }
 0x213   : > { %v569_v40 = vsel %vm568_vm6, %v567_v38, %v551_v39 }
 0x214   : > { %v571_v43 = vsel %vm570_vm7, %v569_v40, %v555_v41 }
 0x216   : > { %v559_v42 = vpop.permute.xlu0 %558 }
 0x217   : > { %v573_v45 = vsel %vm572_vm8, %v571_v43, %v559_v42 }
 0x218   : > { %1136 = vmatpush3.msk.msra.mxu1 %vm749_vm9, %v573_v45 }
 0x219   : > { %1138 = vmatmul.mubr.msk.f32.vlgmr.msra.gmra.mxu1 %vm745_vm10, %v384_v44 }
 0x21d   : > { %v435_v46 = vpop.permute.xlu1 %434 }
 0x221   : > { %v443_v47 = vpop.permute.xlu1 %442 }
 0x222   : > { %v574_v49 = vcombine.low %v435_v46, %v443_v47  ;;  %v575_v52 = vcombine.high %v435_v46, %v443_v47 }
 0x223   : > { %v439_v48 = vpop.permute.xlu0 %438 }
 0x224   : > { %v582_v55 = vrot.slane %v574_v49, %v1447_v60  ;;  %v589_v58 = vrot.slane %v575_v52, %v1447_v60 }
 0x225   : > { %v447_v50 = vpop.permute.xlu1 %446 }
 0x226   : > { %v590_v51 = vcombine.low %v439_v48, %v447_v50  ;;  %v591_v53 = vcombine.high %v439_v48, %v447_v50 }
 0x227   : > { %v451_v54 = vpop.permute.xlu0 %450 }
 0x228   : > { %v598_v56 = vrot.slane %v590_v51, %v1447_v60  ;;  %v605_v59 = vrot.slane %v591_v53, %v1447_v60 }
 0x229   : > { %v455_v57 = vpop.permute.xlu1 %454 }
 0x22a   : > { %v638_v0 = vcombine.low %v582_v55, %v598_v56  ;;  %v639_v1 = vcombine.high %v582_v55, %v598_v56  ;;  %v654_v7 = vcombine.low %v589_v58, %v605_v59  ;;  %v655_v16 = vcombine.high %v589_v58, %v605_v59 }
 0x22b   : > { %v459_v61 = vpop.permute.xlu0 %458 }
 0x22c   : > { %v606_v62 = vcombine.low %v451_v54, %v459_v61  ;;  %v607_v63 = vcombine.high %v451_v54, %v459_v61  ;;  %v646_v13 = vrot.slane %v638_v0, %v1454_v11  ;;  %v653_v15 = vrot.slane %v639_v1, %v1454_v11 }
 0x22d   : > { %v463_v2 = vpop.permute.xlu1 %462  ;;  %v662_v17 = vrot.slane %v654_v7, %v1454_v11  ;;  %v669_v24 = vrot.slane %v655_v16, %v1454_v11 }
 0x22e   : > { %v622_v3 = vcombine.low %v455_v57, %v463_v2  ;;  %v623_v4 = vcombine.high %v455_v57, %v463_v2  ;;  %v614_v5 = vrot.slane %v606_v62, %v1447_v60  ;;  %v621_v6 = vrot.slane %v607_v63, %v1447_v60 }
 0x230   : > { %v630_v9 = vrot.slane %v622_v3, %v1447_v60  ;;  %v637_v12 = vrot.slane %v623_v4, %v1447_v60 }
 0x232   : > { %v670_v14 = vcombine.low %v614_v5, %v630_v9  ;;  %v671_v10 = vcombine.high %v614_v5, %v630_v9  ;;  %v686_v8 = vcombine.low %v621_v6, %v637_v12  ;;  %v687_v18 = vcombine.high %v621_v6, %v637_v12 }
 0x234   : > { %v678_v19 = vrot.slane %v670_v14, %v1454_v11  ;;  %v685_v20 = vrot.slane %v671_v10, %v1454_v11  ;;  %v694_v21 = vrot.slane %v686_v8, %v1454_v11  ;;  %v701_v28 = vrot.slane %v687_v18, %v1454_v11 }
 0x236   : > { %v703_v22 = vcombine.high %v646_v13, %v678_v19  ;;  %v704_v23 = vcombine.low %v653_v15, %v685_v20  ;;  %v702_v25 = vcombine.low %v646_v13, %v678_v19  ;;  %v705_v26 = vcombine.high %v653_v15, %v685_v20 }
 0x237   : > { %v706_v27 = vcombine.low %v662_v17, %v694_v21  ;;  %v707_v29 = vcombine.high %v662_v17, %v694_v21  ;;  %v708_v30 = vcombine.low %v669_v24, %v701_v28  ;;  %v709_v31 = vcombine.high %v669_v24, %v701_v28 }
 0x238   : > { %711 = vrot.lane.b32.xlu0 %v703_v22, %s1311_s26  ;;  %715 = vrot.lane.b32.xlu1 %v704_v23, %s1310_s24  ;;  %s1318_s24 = smov 112  }
 0x23c   : > { %719 = vrot.lane.b32.xlu0 %v705_v26, %s1314_s30  ;;  %723 = vrot.lane.b32.xlu1 %v706_v27, %s1313_s29  ;;  %s1626_s29 = smov 120   ;;  %s1319_s30 = smov 96  }
 0x240   : > { %727 = vrot.lane.b32.xlu0 %v707_v29, %s1316_s8  ;;  %731 = vrot.lane.b32.xlu1 %v708_v30, %s1315_s5  ;;  %s1320_s5 = smov 104   ;;  %s1321_s8 = smov 80  }
 0x244   : > { %735 = vrot.lane.b32.xlu0 %v709_v31, %s1625_s14  ;;  %s1570_s14 = scalar_lea.sflag [#allocation3], %s210_s7 }
 0x2aa   : > { %v712_v32 = vpop.permute.xlu0 %711  ;;  %v716_v33 = vpop.permute.xlu1 %715 }
 0x2ab   : > { %v738_v35 = vsel %vm561_vm3, %v702_v25, %v712_v32 }
 0x2ac   : > { %v739_v37 = vsel %vm563_vm4, %v738_v35, %v716_v33 }
 0x2ae   : > { %v720_v34 = vpop.permute.xlu0 %719  ;;  %v724_v36 = vpop.permute.xlu1 %723 }
 0x2af   : > { %v740_v39 = vsel %vm565_vm5, %v739_v37, %v720_v34 }
 0x2b0   : > { %v741_v40 = vsel %vm229_vm0, %v740_v39, %v724_v36 }
 0x2b2   : > { %v728_v38 = vpop.permute.xlu0 %727  ;;  %v732_v42 = vpop.permute.xlu1 %731 }
 0x2b3   : > { %v742_v41 = vsel %vm568_vm6, %v741_v40, %v728_v38 }
 0x2b4   : > { %v743_v44 = vsel %vm570_vm7, %v742_v41, %v732_v42 }
 0x2b6   : > { %v736_v43 = vpop.permute.xlu0 %735 }
 0x2b7   : > { %v744_v45 = vsel %vm572_vm8, %v743_v44, %v736_v43 }
 0x2d9   : > { %v819_v46 = vpop.f32.mrf.mxu1 }
 0x2da   : > { %v820_v47 = vadd.f32 %v819_v46, %v744_v45 }
 0x2db   : > { %v1139_v48 = vpop.f32.mrf.mxu1 }
 0x2dc   : > { %827 = vrot.lane.b32.xlu0 %v820_v47, %s1318_s24  ;;  %824 = vrot.lane.b32.xlu1 %v820_v47, %s1626_s29  ;;  %s1227_s24 = scalar_lea.vmem %s1558_s13, 1024  ;;  %s1324_s29 = smov [#allocation2]  }
 0x2dd   : > { %p1228_p12 = scmp.ne.s32.totalorder %s1558_s13, %s1227_s24 }
 0x2df   : > { %p1229_p13 = pnand %p1228_p12, %p1391_p4 }
 0x2e0   : > { %833 = vrot.lane.b32.xlu0 %v820_v47, %s1319_s30  ;;  %830 = vrot.lane.b32.xlu1 %v820_v47, %s1320_s5  ;;  %s1231_s30 = sshll.u32 %s1324_s29, 4  ;;  %s1232_s30 = int_to_ptr.vmem [resolvable:$false] %s1231_s30 }
 0x2e1   : > { %p1230_p0 = pneg %p1229_p13  ;;  %s1233_s5 = scalar_lea.vmem %s1232_s30, 2048 }
 0x2e2   : > { %p1234_p1 = scmp.lt.s32.totalorder %s1558_s13, %s1232_s30  ;;  %p1235_p2 = scmp.lt.s32.totalorder %s1233_s5, %s1227_s24 }
 0x2e4   : > { %839 = vrot.lane.b32.xlu0 %v820_v47, %s1321_s8  ;;  %836 = vrot.lane.b32.xlu1 %v820_v47, %s1322_s21  ;;  %p1236_p3 = por %p1235_p2, %p1234_p1 }
 0x2e6   : > { %p1237_p5 = pnand %p1236_p3, %p1230_p0 }
 0x2e8   : > { %842 = vrot.lane.b32.xlu1 %v820_v47, %s1323_s6 }
 0x34e   : > { %v828_v49 = vpop.permute.xlu0 %827  ;;  %v825_v50 = vpop.permute.xlu1 %824 }
 0x34f   : > { %v845_v54 = vcombine.low %v820_v47, %v828_v49  ;;  %v846_v58 = vcombine.high %v820_v47, %v828_v49 }
 0x351   : > { %v853_v63 = vrot.slane %v845_v54, %v1447_v60  ;;  %v860_v4 = vrot.slane %v846_v58, %v1447_v60 }
 0x352   : > { %v834_v51 = vpop.permute.xlu0 %833  ;;  %v831_v52 = vpop.permute.xlu1 %830 }
 0x353   : > { %v861_v53 = vcombine.low %v825_v50, %v831_v52  ;;  %v862_v55 = vcombine.high %v825_v50, %v831_v52 }
 0x355   : > { %v869_v59 = vrot.slane %v861_v53, %v1447_v60  ;;  %v876_v0 = vrot.slane %v862_v55, %v1447_v60 }
 0x356   : > { %v840_v56 = vpop.permute.xlu0 %839  ;;  %v837_v57 = vpop.permute.xlu1 %836 }
 0x357   : > { %v877_v61 = vcombine.low %v834_v51, %v840_v56  ;;  %v878_v62 = vcombine.high %v834_v51, %v840_v56  ;;  %v909_v5 = vcombine.low %v853_v63, %v869_v59  ;;  %v910_v6 = vcombine.high %v853_v63, %v869_v59 }
 0x358   : > { %v925_v14 = vcombine.low %v860_v4, %v876_v0  ;;  %v926_v10 = vcombine.high %v860_v4, %v876_v0 }
 0x359   : > { %v885_v7 = vrot.slane %v877_v61, %v1447_v60  ;;  %v892_v9 = vrot.slane %v878_v62, %v1447_v60  ;;  %v917_v18 = vrot.slane %v909_v5, %v1454_v11  ;;  %v924_v19 = vrot.slane %v910_v6, %v1454_v11 }
 0x35a   : > { %v843_v1 = vpop.permute.xlu1 %842  ;;  %v940_v24 = vrot.slane %v926_v10, %v1454_v11 }
 0x35b   : > { %v893_v2 = vcombine.low %v837_v57, %v843_v1  ;;  %v894_v3 = vcombine.high %v837_v57, %v843_v1 }
 0x35d   : > { %v901_v12 = vrot.slane %v893_v2, %v1447_v60  ;;  %v908_v13 = vrot.slane %v894_v3, %v1447_v60  ;;  %v933_v60 = vrot.slane %v925_v14, %v1454_v11 }
 0x35f   : > { %v941_v8 = vcombine.low %v885_v7, %v901_v12  ;;  %v942_v15 = vcombine.high %v885_v7, %v901_v12  ;;  %v957_v16 = vcombine.low %v892_v9, %v908_v13  ;;  %v958_v17 = vcombine.high %v892_v9, %v908_v13 }
 0x361   : > { %v949_v20 = vrot.slane %v941_v8, %v1454_v11  ;;  %v956_v21 = vrot.slane %v942_v15, %v1454_v11  ;;  %v965_v22 = vrot.slane %v957_v16, %v1454_v11  ;;  %v972_v23 = vrot.slane %v958_v17, %v1454_v11 }
 0x363   : > { %v973_v25 = vcombine.low %v917_v18, %v949_v20  ;;  %v974_v26 = vcombine.high %v917_v18, %v949_v20  ;;  %v975_v27 = vcombine.low %v924_v19, %v956_v21  ;;  %v976_v28 = vcombine.high %v924_v19, %v956_v21 }
 0x364   : > { %v977_v29 = vcombine.low %v933_v60, %v965_v22  ;;  %v978_v30 = vcombine.high %v933_v60, %v965_v22  ;;  %v979_v31 = vcombine.low %v940_v24, %v972_v23  ;;  %v980_v32 = vcombine.high %v940_v24, %v972_v23 }
 0x365   : > { %981 = vst.msk [vmem:[%s212_s12] sm:$0xff] %vm561_vm3, %v973_v25  ;;  %982 = vst.msk [vmem:[%s212_s12 + $0x8] sm:$0xff] %vm561_vm3, %v974_v26 }
 0x366   : > { %983 = vst.msk [vmem:[%s212_s12 + $0x10] sm:$0xff] %vm561_vm3, %v975_v27  ;;  %984 = vst.msk [vmem:[%s212_s12 + $0x18] sm:$0xff] %vm561_vm3, %v976_v28 }
 0x367   : > { %985 = vst.msk [vmem:[%s212_s12 + $0x20] sm:$0xff] %vm561_vm3, %v977_v29  ;;  %986 = vst.msk [vmem:[%s212_s12 + $0x28] sm:$0xff] %vm561_vm3, %v978_v30 }
 0x368   : > { %987 = vst.msk [vmem:[%s212_s12 + $0x30] sm:$0xff] %vm561_vm3, %v979_v31  ;;  %988 = vst.msk [vmem:[%s212_s12 + $0x38] sm:$0xff] %vm561_vm3, %v980_v32 }
 0x369   : > { %1240 = shalt.err (!%p1237_p5)
}
 0x36a   : > { %s1241_s8 = scalar_lea.hbm %s1556_s11, 1024  ;;  %s1245_s7 = scalar_lea.hbm %s1620_s4, 2048 }
 0x36b   : > { %p1242_p6 = scmp.ne.s32.totalorder %s1556_s11, %s1241_s8  ;;  %p1246_p10 = scmp.lt.s32.totalorder %s1556_s11, %s1620_s4 }
 0x36c   : > { %p1247_p11 = scmp.lt.s32.totalorder %s1245_s7, %s1241_s8 }
 0x36d   : > { %p1243_p7 = pnand %p1242_p6, %p1391_p4 }
 0x36e   : > { %p1248_p12 = por %p1247_p11, %p1246_p10 }
 0x36f   : > { %p1244_p9 = pneg %p1243_p7 }
 0x371   : > { %p1249_p13 = pnand %p1248_p12, %p1244_p9 }
 0x373   : > { %1252 = shalt.err (!%p1249_p13)
}
 0x374   : > { %s1325_s12 = smov 128  }
 0x375   : > { %1140 = dma.vmem_to_hbm [thread:$0]  (%p1391_p4), %s1558_s13, 1024, %s1556_s11, %s1570_s14, %s1325_s12, %s1325_s12, %s1311_s26  }
 0x376 PF: > { %p1146_p0 = scmp.ge.s32.totalorder %s1303_s20, 2  ;;  %s1019_s18 = sand.u32 1, %s1283_s15  }
 0x377   : > { %s1020_s22 = scalar_lea.sflag [#allocation3], %s1019_s18 }
 0x378   : > { %p1143_p1 = pnand %p1146_p0, %p1398_p8 }
 0x37a   : > { %p1144_p2 = pneg %p1143_p1 }
 0x37c   : > { %1278 = dma.done.wait (%p1144_p2), %s1020_s22, 1024  }
 0x37d   : > { %1280 = vsyncadd (%p1144_p2), %s1020_s22, 4294966272  ;;  %s17_s20 = sadd.s32 1, %s1303_s20   ;;  %s1627_s15 = smov %s1287_s16 }
 0x37e   : > { %p14_p3 = scmp.ge.s32.totalorder %s17_s20, 4   ;;  %s1628_s16 = smov %s1291_s17 }
 0x37f   : > { %s1629_s17 = smov %s1404_s28  ;;  %s1630_s18 = smov %s1299_s19 }
 0x380   : > { %s1631_s19 = smov %s1633_s23  ;;  %16 = sbr.rel (!%p14_p3) target bundleno = 4 (0x4), region = 71 }
 0x385   :  { %1025 = vsyncpa [#allocation3], 1 }
 0x386   :  { %1027 = vsyncpa [#allocation3 + $0x1], 1 }

</bundles_post_ra>
